<compile_context>
chip_gen: v5e
topology: v5e:2x2
jax: 0.10.0
libtpu: 0.0.40
codegen_flags: <defaults>
</compile_context>

<pallas_src>
import jax
import jax.numpy as jnp
from jax import lax
from jax.experimental import pallas as pl
from jax.experimental.pallas import tpu as pltpu

K = 16        # patch size hard-coded in the PyTorch forward
EPS = 1e-12   # F.normalize epsilon
_MiB = 1024 * 1024


# --------------------------- kernel A: energy + argmax/argmin ---------------------------
def _energy_argmax_kernel(wq_ref, bq_ref, wk_ref, bk_ref,
                          fe_ref, fo_ref, imax_ref, imin_ref):
    """Grid step = (batch b, query tile qt).

    fe_ref : (1, C, Tq, P)  feat_edit patches for this query tile
    fo_ref : (1, C, L,  P)  feat_ori patches, full key set (block reused across qt)
    imax_ref, imin_ref : (1, Tq, 1) int32 outputs (key index per query patch)
    wq/wk : (C,) SMEM ; bq/bk : (1,) SMEM
    """
    C = fe_ref.shape[1]
    Lk = fo_ref.shape[2]

    # 1x1 convs as channel-weighted sums, directly in patch layout.
    q = wq_ref[0] * fe_ref[0, 0]
    kp = wk_ref[0] * fo_ref[0, 0]
    for c in range(1, C):
        q = q + wq_ref[c] * fe_ref[0, c]
        kp = kp + wk_ref[c] * fo_ref[0, c]
    q = q + bq_ref[0]        # (Tq, P) query patches
    kp = kp + bk_ref[0]      # (L,  P) key patches

    # L2-normalize each patch vector (lane reduce + EUP rsqrt).
    qn = q * lax.rsqrt(jnp.maximum(jnp.sum(q * q, axis=-1, keepdims=True), EPS * EPS))
    kn = kp * lax.rsqrt(jnp.maximum(jnp.sum(kp * kp, axis=-1, keepdims=True), EPS * EPS))

    # energy[j, i] = <query patch j, key patch i>; bf16 operands, f32 accumulation.
    energy = lax.dot_general(qn.astype(jnp.bfloat16), kn.astype(jnp.bfloat16),
                             (((1,), (1,)), ((), ())),
                             preferred_element_type=jnp.float32)          # (Tq, L)

    # argmax / argmin over keys with first-index tie-break; index vectors only.
    col = lax.broadcasted_iota(jnp.int32, energy.shape, 1)
    e_max = jnp.max(energy, axis=1, keepdims=True)
    idx_max = jnp.min(jnp.where(energy == e_max, col, Lk), axis=1, keepdims=True)  # (Tq,1)
    e_min = jnp.min(energy, axis=1, keepdims=True)
    idx_min = jnp.min(jnp.where(energy == e_min, col, Lk), axis=1, keepdims=True)

    imax_ref[0] = idx_max.astype(jnp.int32)
    imin_ref[0] = idx_min.astype(jnp.int32)


# ------------------------------ kernel B: index row gather ------------------------------
def _gather_kernel(imax_ref, imin_ref, g2_ref, x1_ref, x2_ref, out_ref):
    """Grid step = (batch b, query tile qt).

    imax_ref/imin_ref : (B, L) int32 in SMEM (scalar-readable indices)
    x1_ref/x2_ref     : (1, L, C*P) value patch slabs (VMEM, reused across qt)
    out_ref           : (1, Tq, C*P)
    g2_ref            : (1,) SMEM
    """
    b = pl.program_id(0)
    qt = pl.program_id(1)
    Tq = out_ref.shape[1]
    base = qt * Tq
    g2 = g2_ref[0]

    def body(j, carry):
        i1 = imax_ref[b, base + j]
        i2 = imin_ref[b, base + j]
        row = x1_ref[0, pl.ds(i1, 1), :] + g2 * x2_ref[0, pl.ds(i2, 1), :]
        out_ref[0, pl.ds(j, 1), :] = row.astype(out_ref.dtype)
        return carry

    lax.fori_loop(0, Tq, body, 0)


# ----------------------------- layout plumbing (unfold / fold) -----------------------------
def _to_patches_cfirst(x, k):
    # (B, C, H, W) -> (B, C, L, P): per-channel k x k patch vectors.
    B, C, H, W = x.shape
    nh, nw = H // k, W // k
    return (x.reshape(B, C, nh, k, nw, k)
             .transpose(0, 1, 2, 4, 3, 5)
             .reshape(B, C, nh * nw, k * k))


def _to_patches_lfirst(x, k):
    # (B, C, H, W) -> (B, L, C*P): whole (C, k, k) patches as lane-dense rows.
    B, C, H, W = x.shape
    nh, nw = H // k, W // k
    return (x.reshape(B, C, nh, k, nw, k)
             .transpose(0, 2, 4, 1, 3, 5)
             .reshape(B, nh * nw, C * k * k))


def _from_patches_lfirst(xp, C, H, W, k):
    # (B, L, C*P) -> (B, C, H, W): inverse of _to_patches_lfirst (== F.fold, stride == k).
    B = xp.shape[0]
    nh, nw = H // k, W // k
    return (xp.reshape(B, nh, nw, C, k, k)
              .transpose(0, 3, 1, 4, 2, 5)
              .reshape(B, C, H, W))


def _pick_query_tile(L):
    # <= 256 rows keeps the (Tq, P) / (Tq, C*P) working set inside the v7x VMEM budget
    # while staying a multiple of (8, 128)-friendly sizes; small images use a single tile.
    if L <= 256:
        return L
    for t in (256, 128, 64, 32, 16, 8):
        if L % t == 0:
            return t
    return L


def _vmem_limit(est_bytes):
    # 2x slack over the static block estimate, clamped to a budget safe on every
    # generation (v7x has only 64 MiB of VMEM per TensorCore).
    return int(min(48 * _MiB, max(16 * _MiB, 2 * est_bytes)))


@jax.jit
def attention_pallas(feat_edit, feat_ori, x1, x2, wq, bq, wk, bk, gamma2):
    B, C, H, W = x1.shape
    assert H % K == 0 and W % K == 0, "spatial dims must be multiples of 16"
    L = (H // K) * (W // K)
    P = K * K
    CP = C * P
    Tq = _pick_query_tile(L)
    nQT = L // Tq

    fe_p = _to_patches_cfirst(feat_edit, K)   # (B, C, L, P)
    fo_p = _to_patches_cfirst(feat_ori, K)    # (B, C, L, P)
    x1_p = _to_patches_lfirst(x1, K)          # (B, L, C*P)
    x2_p = _to_patches_lfirst(x2, K)          # (B, L, C*P)

    smem = pl.BlockSpec(memory_space=pltpu.SMEM)

    # --- kernel A: projections + normalize + energy + argmax/argmin indices ---
    est_a = 4 * (2 * C * Tq * P + 2 * C * L * P) + 8 * Tq * L + 16 * Tq
    imax, imin = pl.pallas_call(
        _energy_argmax_kernel,
        out_shape=(jax.ShapeDtypeStruct((B, L, 1), jnp.int32),
                   jax.ShapeDtypeStruct((B, L, 1), jnp.int32)),
        grid_spec=pltpu.PrefetchScalarGridSpec(
            num_scalar_prefetch=0,
            grid=(B, nQT),
            in_specs=[
                smem, smem, smem, smem,                                  # wq, bq, wk, bk
                pl.BlockSpec((1, C, Tq, P), lambda b, q: (b, 0, q, 0)),  # feat_edit tile
                pl.BlockSpec((1, C, L, P), lambda b, q: (b, 0, 0, 0)),   # feat_ori (full keys)
            ],
            out_specs=[pl.BlockSpec((1, Tq, 1), lambda b, q: (b, q, 0)),
                       pl.BlockSpec((1, Tq, 1), lambda b, q: (b, q, 0))],
        ),
        compiler_params=pltpu.CompilerParams(
            dimension_semantics=("parallel", "parallel"),
            vmem_limit_bytes=_vmem_limit(est_a),
        ),
    )(wq, bq, wk, bk, fe_p, fo_p)

    # --- kernel B: SMEM-index row gather + gamma_2 combine ---
    est_b = 4 * (2 * 2 * L * CP + 2 * Tq * CP)
    out_p = pl.pallas_call(
        _gather_kernel,
        out_shape=jax.ShapeDtypeStruct((B, L, CP), x1.dtype),
        grid_spec=pltpu.PrefetchScalarGridSpec(
            num_scalar_prefetch=0,
            grid=(B, nQT),
            in_specs=[
                smem, smem, smem,                                   # idx_max, idx_min, gamma_2
                pl.BlockSpec((1, L, CP), lambda b, q: (b, 0, 0)),   # x1 patches (full, per batch)
                pl.BlockSpec((1, L, CP), lambda b, q: (b, 0, 0)),   # x2 patches (full, per batch)
            ],
            out_specs=pl.BlockSpec((1, Tq, CP), lambda b, q: (b, q, 0)),
        ),
        compiler_params=pltpu.CompilerParams(
            dimension_semantics=("parallel", "parallel"),
            vmem_limit_bytes=_vmem_limit(est_b),
        ),
    )(imax.reshape(B, L), imin.reshape(B, L), gamma2, x1_p, x2_p)

    return _from_patches_lfirst(out_p, C, H, W, K)


# ---------------------------------- pure-JAX reference ----------------------------------
def attention_reference(feat_edit, feat_ori, x1, x2, wq, bq, wk, bk, gamma2):
    B, C, H, W = x1.shape
    nh, nw = H // K, W // K
    L, P = nh * nw, K * K

    proj_q = jnp.einsum('bchw,c->bhw', feat_edit, wq) + bq[0]   # 1x1 convs
    proj_k = jnp.einsum('bchw,c->bhw', feat_ori, wk) + bk[0]

    def unfold1(m):   # (B, H, W) -> (B, L, P)
        return m.reshape(B, nh, K, nw, K).transpose(0, 1, 3, 2, 4).reshape(B, L, P)

    qp, kpat = unfold1(proj_q), unfold1(proj_k)
    qn = qp / jnp.maximum(jnp.linalg.norm(qp, axis=-1, keepdims=True), EPS)
    kn = kpat / jnp.maximum(jnp.linalg.norm(kpat, axis=-1, keepdims=True), EPS)

    energy = jnp.einsum('bip,bjp->bij', kn, qn,
                        precision=lax.Precision.HIGHEST)        # (B, L, L): key_i . query_j
    idx_max = jnp.argmax(energy, axis=1)                        # (B, L), per query patch j
    idx_min = jnp.argmin(energy, axis=1)

    def unfoldC(x):   # (B, C, H, W) -> (B, L, C, K, K)
        return x.reshape(B, C, nh, K, nw, K).transpose(0, 2, 4, 1, 3, 5).reshape(B, L, C, K, K)

    def fold(xp):     # (B, L, C, K, K) -> (B, C, H, W)
        return xp.reshape(B, nh, nw, C, K, K).transpose(0, 3, 1, 4, 2, 5).reshape(B, C, H, W)

    g_max = jnp.take_along_axis(unfoldC(x1), idx_max[:, :, None, None, None], axis=1)
    g_min = jnp.take_along_axis(unfoldC(x2), idx_min[:, :, None, None, None], axis=1)
    return fold(g_max) + gamma2[0] * fold(g_min)


if __name__ == "__main__":
    B, C, H, W = 2, 3, 32, 32          # in_dim=3 default; 32x32 -> 2x2 = 4 patches of 16x16
    nh, nw = H // K, W // K
    L, P = nh * nw, K * K

    keys = jax.random.split(jax.random.PRNGKey(0), 8)

    # Test inputs: channel 0 carries strong, well-separated patch patterns so the
    # argmax/argmin decisions have large margins (robust to bf16 matmul rounding), while
    # channels 1..2, the conv biases and a nonzero gamma_2 exercise the full compute path.
    G = jax.random.normal(keys[0], (B, L, P), jnp.float32)        # key-side base patterns
    jmax = (jnp.arange(L) + 1) % L                                 # intended argmax per query
    jmin = (jnp.arange(L) + 2) % L                                 # intended argmin per query
    Q = (2.0 * G[:, jmax, :] - 1.0 * G[:, jmin, :]
         + 0.1 * jax.random.normal(keys[1], (B, L, P), jnp.float32))

    def patches_to_plane(p):   # (B, L, P) -> (B, H, W)
        return p.reshape(B, nh, nw, K, K).transpose(0, 1, 3, 2, 4).reshape(B, H, W)

    feat_ori = jnp.stack(
        [patches_to_plane(G),
         0.2 * jax.random.normal(keys[2], (B, H, W), jnp.float32),
         0.2 * jax.random.normal(keys[3], (B, H, W), jnp.float32)], axis=1)
    feat_edit = jnp.stack(
        [patches_to_plane(Q),
         0.2 * jax.random.normal(keys[4], (B, H, W), jnp.float32),
         0.2 * jax.random.normal(keys[5], (B, H, W), jnp.float32)], axis=1)

    x1 = jax.random.normal(keys[6], (B, C, H, W), jnp.float32)
    x2 = jax.random.normal(keys[7], (B, C, H, W), jnp.float32)

    wq = jnp.array([1.0, 0.05, -0.04], jnp.float32)
    bq = jnp.array([0.02], jnp.float32)
    wk = jnp.array([1.0, -0.03, 0.06], jnp.float32)
    bk = jnp.array([-0.01], jnp.float32)
    gamma2 = jnp.array([0.5], jnp.float32)   # nonzero so the argmin branch is exercised

    out = attention_pallas(feat_edit, feat_ori, x1, x2, wq, bq, wk, bk, gamma2)
    out = jax.block_until_ready(out)

    ref = attention_reference(feat_edit, feat_ori, x1, x2, wq, bq, wk, bk, gamma2)
    assert out.shape == (B, C, H, W)
    assert jnp.allclose(out, ref, rtol=1e-2, atol=1e-2), (
        "mismatch vs reference, max abs diff = %s" % jnp.max(jnp.abs(out - ref)))
    print("KERNEL_OK")
</pallas_src>

<mosaic_0001>
module attributes {stable_mosaic.version = 11 : i64} {
  func.func @_energy_argmax_kernel(%arg0: i32, %arg1: i32, %arg2: memref<3xf32, #tpu.memory_space<smem>>, %arg3: memref<1xf32, #tpu.memory_space<smem>>, %arg4: memref<3xf32, #tpu.memory_space<smem>>, %arg5: memref<1xf32, #tpu.memory_space<smem>>, %arg6: memref<1x3x4x256xf32, #tpu.memory_space<vmem>>, %arg7: memref<1x3x4x256xf32, #tpu.memory_space<vmem>>, %arg8: memref<1x4x1xi32, #tpu.memory_space<vmem>>, %arg9: memref<1x4x1xi32, #tpu.memory_space<vmem>>) attributes {dimension_semantics = [#tpu.dimension_semantics<parallel>, #tpu.dimension_semantics<parallel>], iteration_bounds = array<i64: 2, 1>, scalar_prefetch = 0 : i64, scratch_operands = 0 : i64, tpu.core_type = #tpu.core_type<tc>, window_params = [{transform_indices = @transform_0, window_bounds = array<i64: 3>}, {transform_indices = @transform_1, window_bounds = array<i64: 1>}, {transform_indices = @transform_2, window_bounds = array<i64: 3>}, {transform_indices = @transform_3, window_bounds = array<i64: 1>}, {transform_indices = @transform_4, window_bounds = array<i64: 1, 3, 4, 256>}, {transform_indices = @transform_5, window_bounds = array<i64: 1, 3, 4, 256>}, {transform_indices = @transform_6, window_bounds = array<i64: 1, 4, 1>}, {transform_indices = @transform_7, window_bounds = array<i64: 1, 4, 1>}]} {
    %c0 = arith.constant 0 : index
    %0 = memref.load %arg2[%c0] : memref<3xf32, #tpu.memory_space<smem>>
    %c0_0 = arith.constant 0 : index
    %c0_1 = arith.constant 0 : index
    %c0_2 = arith.constant 0 : index
    %c0_3 = arith.constant 0 : index
    %1 = vector.load %arg6[%c0_0, %c0_1, %c0_2, %c0_3] : memref<1x3x4x256xf32, #tpu.memory_space<vmem>>, vector<1x1x4x256xf32>
    %2 = vector.shape_cast %1 : vector<1x1x4x256xf32> to vector<4x256xf32>
    %3 = vector.broadcast %0 : f32 to vector<4x256xf32>
    %4 = arith.mulf %3, %2 : vector<4x256xf32>
    %c0_4 = arith.constant 0 : index
    %5 = memref.load %arg4[%c0_4] : memref<3xf32, #tpu.memory_space<smem>>
    %c0_5 = arith.constant 0 : index
    %c0_6 = arith.constant 0 : index
    %c0_7 = arith.constant 0 : index
    %c0_8 = arith.constant 0 : index
    %6 = vector.load %arg7[%c0_5, %c0_6, %c0_7, %c0_8] : memref<1x3x4x256xf32, #tpu.memory_space<vmem>>, vector<1x1x4x256xf32>
    %7 = vector.shape_cast %6 : vector<1x1x4x256xf32> to vector<4x256xf32>
    %8 = vector.broadcast %5 : f32 to vector<4x256xf32>
    %9 = arith.mulf %8, %7 : vector<4x256xf32>
    %c1 = arith.constant 1 : index
    %10 = memref.load %arg2[%c1] : memref<3xf32, #tpu.memory_space<smem>>
    %c0_9 = arith.constant 0 : index
    %c1_10 = arith.constant 1 : index
    %c0_11 = arith.constant 0 : index
    %c0_12 = arith.constant 0 : index
    %11 = vector.load %arg6[%c0_9, %c1_10, %c0_11, %c0_12] : memref<1x3x4x256xf32, #tpu.memory_space<vmem>>, vector<1x1x4x256xf32>
    %12 = vector.shape_cast %11 : vector<1x1x4x256xf32> to vector<4x256xf32>
    %13 = vector.broadcast %10 : f32 to vector<4x256xf32>
    %14 = arith.mulf %13, %12 : vector<4x256xf32>
    %15 = arith.addf %4, %14 : vector<4x256xf32>
    %c1_13 = arith.constant 1 : index
    %16 = memref.load %arg4[%c1_13] : memref<3xf32, #tpu.memory_space<smem>>
    %c0_14 = arith.constant 0 : index
    %c1_15 = arith.constant 1 : index
    %c0_16 = arith.constant 0 : index
    %c0_17 = arith.constant 0 : index
    %17 = vector.load %arg7[%c0_14, %c1_15, %c0_16, %c0_17] : memref<1x3x4x256xf32, #tpu.memory_space<vmem>>, vector<1x1x4x256xf32>
    %18 = vector.shape_cast %17 : vector<1x1x4x256xf32> to vector<4x256xf32>
    %19 = vector.broadcast %16 : f32 to vector<4x256xf32>
    %20 = arith.mulf %19, %18 : vector<4x256xf32>
    %21 = arith.addf %9, %20 : vector<4x256xf32>
    %c2 = arith.constant 2 : index
    %22 = memref.load %arg2[%c2] : memref<3xf32, #tpu.memory_space<smem>>
    %c0_18 = arith.constant 0 : index
    %c2_19 = arith.constant 2 : index
    %c0_20 = arith.constant 0 : index
    %c0_21 = arith.constant 0 : index
    %23 = vector.load %arg6[%c0_18, %c2_19, %c0_20, %c0_21] : memref<1x3x4x256xf32, #tpu.memory_space<vmem>>, vector<1x1x4x256xf32>
    %24 = vector.shape_cast %23 : vector<1x1x4x256xf32> to vector<4x256xf32>
    %25 = vector.broadcast %22 : f32 to vector<4x256xf32>
    %26 = arith.mulf %25, %24 : vector<4x256xf32>
    %27 = arith.addf %15, %26 : vector<4x256xf32>
    %c2_22 = arith.constant 2 : index
    %28 = memref.load %arg4[%c2_22] : memref<3xf32, #tpu.memory_space<smem>>
    %c0_23 = arith.constant 0 : index
    %c2_24 = arith.constant 2 : index
    %c0_25 = arith.constant 0 : index
    %c0_26 = arith.constant 0 : index
    %29 = vector.load %arg7[%c0_23, %c2_24, %c0_25, %c0_26] : memref<1x3x4x256xf32, #tpu.memory_space<vmem>>, vector<1x1x4x256xf32>
    %30 = vector.shape_cast %29 : vector<1x1x4x256xf32> to vector<4x256xf32>
    %31 = vector.broadcast %28 : f32 to vector<4x256xf32>
    %32 = arith.mulf %31, %30 : vector<4x256xf32>
    %33 = arith.addf %21, %32 : vector<4x256xf32>
    %c0_27 = arith.constant 0 : index
    %34 = memref.load %arg3[%c0_27] : memref<1xf32, #tpu.memory_space<smem>>
    %35 = vector.broadcast %34 : f32 to vector<4x256xf32>
    %36 = arith.addf %27, %35 : vector<4x256xf32>
    %c0_28 = arith.constant 0 : index
    %37 = memref.load %arg5[%c0_28] : memref<1xf32, #tpu.memory_space<smem>>
    %38 = vector.broadcast %37 : f32 to vector<4x256xf32>
    %39 = arith.addf %33, %38 : vector<4x256xf32>
    %40 = arith.mulf %36, %36 : vector<4x256xf32>
    %cst = arith.constant dense<0.000000e+00> : vector<4xf32>
    %41 = vector.multi_reduction <add>, %40, %cst [1] : vector<4x256xf32> to vector<4xf32>
    %42 = vector.shape_cast %41 : vector<4xf32> to vector<4x1xf32>
    %cst_29 = arith.constant 1.000000e-24 : f32
    %43 = vector.broadcast %cst_29 : f32 to vector<4x1xf32>
    %44 = arith.maximumf %42, %43 : vector<4x1xf32>
    %45 = math.rsqrt %44 : vector<4x1xf32>
    %46 = vector.broadcast %45 : vector<4x1xf32> to vector<4x256xf32>
    %47 = arith.mulf %36, %46 : vector<4x256xf32>
    %48 = arith.mulf %39, %39 : vector<4x256xf32>
    %cst_30 = arith.constant dense<0.000000e+00> : vector<4xf32>
    %49 = vector.multi_reduction <add>, %48, %cst_30 [1] : vector<4x256xf32> to vector<4xf32>
    %50 = vector.shape_cast %49 : vector<4xf32> to vector<4x1xf32>
    %cst_31 = arith.constant 1.000000e-24 : f32
    %51 = vector.broadcast %cst_31 : f32 to vector<4x1xf32>
    %52 = arith.maximumf %50, %51 : vector<4x1xf32>
    %53 = math.rsqrt %52 : vector<4x1xf32>
    %54 = vector.broadcast %53 : vector<4x1xf32> to vector<4x256xf32>
    %55 = arith.mulf %39, %54 : vector<4x256xf32>
    %56 = arith.truncf %47 : vector<4x256xf32> to vector<4x256xbf16>
    %57 = arith.truncf %55 : vector<4x256xf32> to vector<4x256xbf16>
    %cst_32 = arith.constant dense<0.000000e+00> : vector<4x4xf32>
    %58 = tpu.matmul %56, %57, %cst_32 {dimension_numbers = #tpu.dot_dimension_numbers<[1], [1], [0], [0], [0, 0, 1, 0], [], []>} : vector<4x256xbf16>, vector<4x256xbf16>, vector<4x4xf32> -> vector<4x4xf32>
    %59 = tpu.iota {dimensions = array<i32: 1>} : vector<4x4xi32>
    %cst_33 = arith.constant dense<0xFF800000> : vector<4xf32>
    %60 = vector.multi_reduction <maximumf>, %58, %cst_33 [1] : vector<4x4xf32> to vector<4xf32>
    %61 = vector.shape_cast %60 : vector<4xf32> to vector<4x1xf32>
    %62 = vector.broadcast %61 : vector<4x1xf32> to vector<4x4xf32>
    %63 = arith.cmpf oeq, %58, %62 : vector<4x4xf32>
    %c4_i32 = arith.constant 4 : i32
    %64 = vector.broadcast %c4_i32 : i32 to vector<4x4xi32>
    %65 = arith.select %63, %59, %64 : vector<4x4xi1>, vector<4x4xi32>
    %cst_34 = arith.constant dense<2147483647> : vector<4xi32>
    %66 = vector.multi_reduction <minsi>, %65, %cst_34 [1] : vector<4x4xi32> to vector<4xi32>
    %67 = vector.shape_cast %66 : vector<4xi32> to vector<4x1xi32>
    %cst_35 = arith.constant dense<0x7F800000> : vector<4xf32>
    %68 = vector.multi_reduction <minimumf>, %58, %cst_35 [1] : vector<4x4xf32> to vector<4xf32>
    %69 = vector.shape_cast %68 : vector<4xf32> to vector<4x1xf32>
    %70 = vector.broadcast %69 : vector<4x1xf32> to vector<4x4xf32>
    %71 = arith.cmpf oeq, %58, %70 : vector<4x4xf32>
    %c4_i32_36 = arith.constant 4 : i32
    %72 = vector.broadcast %c4_i32_36 : i32 to vector<4x4xi32>
    %73 = arith.select %71, %59, %72 : vector<4x4xi1>, vector<4x4xi32>
    %cst_37 = arith.constant dense<2147483647> : vector<4xi32>
    %74 = vector.multi_reduction <minsi>, %73, %cst_37 [1] : vector<4x4xi32> to vector<4xi32>
    %75 = vector.shape_cast %74 : vector<4xi32> to vector<4x1xi32>
    %c0_38 = arith.constant 0 : index
    %c0_39 = arith.constant 0 : index
    %c0_40 = arith.constant 0 : index
    %76 = vector.load %arg8[%c0_38, %c0_39, %c0_40] : memref<1x4x1xi32, #tpu.memory_space<vmem>>, vector<1x4x1xi32>
    %77 = vector.shape_cast %76 : vector<1x4x1xi32> to vector<4x1xi32>
    %78 = vector.shape_cast %67 : vector<4x1xi32> to vector<1x4x1xi32>
    tpu.vector_store %arg8[%c0_38, %c0_39, %c0_40], %78 {strides = array<i32>} : memref<1x4x1xi32, #tpu.memory_space<vmem>>, vector<1x4x1xi32>,
    %c0_41 = arith.constant 0 : index
    %c0_42 = arith.constant 0 : index
    %c0_43 = arith.constant 0 : index
    %79 = vector.load %arg9[%c0_41, %c0_42, %c0_43] : memref<1x4x1xi32, #tpu.memory_space<vmem>>, vector<1x4x1xi32>
    %80 = vector.shape_cast %79 : vector<1x4x1xi32> to vector<4x1xi32>
    %81 = vector.shape_cast %75 : vector<4x1xi32> to vector<1x4x1xi32>
    tpu.vector_store %arg9[%c0_41, %c0_42, %c0_43], %81 {strides = array<i32>} : memref<1x4x1xi32, #tpu.memory_space<vmem>>, vector<1x4x1xi32>,
    return
  }
  func.func @transform_0(%arg0: i32, %arg1: i32) -> i32 {
    %c0_i32 = arith.constant 0 : i32
    %c0_i32_0 = arith.constant 0 : i32
    return %c0_i32 : i32
  }
  func.func @transform_1(%arg0: i32, %arg1: i32) -> i32 {
    %c0_i32 = arith.constant 0 : i32
    %c0_i32_0 = arith.constant 0 : i32
    return %c0_i32 : i32
  }
  func.func @transform_2(%arg0: i32, %arg1: i32) -> i32 {
    %c0_i32 = arith.constant 0 : i32
    %c0_i32_0 = arith.constant 0 : i32
    return %c0_i32 : i32
  }
  func.func @transform_3(%arg0: i32, %arg1: i32) -> i32 {
    %c0_i32 = arith.constant 0 : i32
    %c0_i32_0 = arith.constant 0 : i32
    return %c0_i32 : i32
  }
  func.func @transform_4(%arg0: i32, %arg1: i32) -> (i32, i32, i32, i32) {
    %c0_i32 = arith.constant 0 : i32
    %c0_i32_0 = arith.constant 0 : i32
    %c0_i32_1 = arith.constant 0 : i32
    return %arg0, %c0_i32, %arg1, %c0_i32_0 : i32, i32, i32, i32
  }
  func.func @transform_5(%arg0: i32, %arg1: i32) -> (i32, i32, i32, i32) {
    %c0_i32 = arith.constant 0 : i32
    %c0_i32_0 = arith.constant 0 : i32
    %c0_i32_1 = arith.constant 0 : i32
    %c0_i32_2 = arith.constant 0 : i32
    return %arg0, %c0_i32, %c0_i32_0, %c0_i32_1 : i32, i32, i32, i32
  }
  func.func @transform_6(%arg0: i32, %arg1: i32) -> (i32, i32, i32) {
    %c0_i32 = arith.constant 0 : i32
    %c0_i32_0 = arith.constant 0 : i32
    return %arg0, %arg1, %c0_i32 : i32, i32, i32
  }
  func.func @transform_7(%arg0: i32, %arg1: i32) -> (i32, i32, i32) {
    %c0_i32 = arith.constant 0 : i32
    %c0_i32_0 = arith.constant 0 : i32
    return %arg0, %arg1, %c0_i32 : i32, i32, i32
  }
}

module attributes {stable_mosaic.version = 11 : i64} {
  func.func @_gather_kernel(%arg0: i32, %arg1: i32, %arg2: memref<2x4xi32, #tpu.memory_space<smem>>, %arg3: memref<2x4xi32, #tpu.memory_space<smem>>, %arg4: memref<1xf32, #tpu.memory_space<smem>>, %arg5: memref<1x4x768xf32, #tpu.memory_space<vmem>>, %arg6: memref<1x4x768xf32, #tpu.memory_space<vmem>>, %arg7: memref<1x4x768xf32, #tpu.memory_space<vmem>>) attributes {dimension_semantics = [#tpu.dimension_semantics<parallel>, #tpu.dimension_semantics<parallel>], iteration_bounds = array<i64: 2, 1>, scalar_prefetch = 0 : i64, scratch_operands = 0 : i64, tpu.core_type = #tpu.core_type<tc>, window_params = [{transform_indices = @transform_0, window_bounds = array<i64: 2, 4>}, {transform_indices = @transform_1, window_bounds = array<i64: 2, 4>}, {transform_indices = @transform_2, window_bounds = array<i64: 1>}, {transform_indices = @transform_3, window_bounds = array<i64: 1, 4, 768>}, {transform_indices = @transform_4, window_bounds = array<i64: 1, 4, 768>}, {transform_indices = @transform_5, window_bounds = array<i64: 1, 4, 768>}]} {
    %c4_i32 = arith.constant 4 : i32
    %0 = arith.muli %arg1, %c4_i32 : i32
    %c0 = arith.constant 0 : index
    %1 = memref.load %arg4[%c0] : memref<1xf32, #tpu.memory_space<smem>>
    %c0_i32 = arith.constant 0 : i32
    %c4_i32_0 = arith.constant 4 : i32
    %2 = arith.addi %c0_i32, %c4_i32_0 : i32
    %c1_i32 = arith.constant 1 : i32
    scf.for %arg8 = %c0_i32 to %2 step %c1_i32  : i32 {
      %3 = arith.addi %0, %arg8 : i32
      %4 = arith.index_cast %arg0 : i32 to index
      %5 = arith.index_cast %3 : i32 to index
      %6 = memref.load %arg2[%4, %5] : memref<2x4xi32, #tpu.memory_space<smem>>
      %7 = arith.addi %0, %arg8 : i32
      %8 = arith.index_cast %arg0 : i32 to index
      %9 = arith.index_cast %7 : i32 to index
      %10 = memref.load %arg3[%8, %9] : memref<2x4xi32, #tpu.memory_space<smem>>
      %c0_2 = arith.constant 0 : index
      %11 = arith.index_cast %6 : i32 to index
      %c0_3 = arith.constant 0 : index
      %12 = vector.load %arg5[%c0_2, %11, %c0_3] : memref<1x4x768xf32, #tpu.memory_space<vmem>>, vector<1x1x768xf32>
      %13 = vector.shape_cast %12 : vector<1x1x768xf32> to vector<1x768xf32>
      %c0_4 = arith.constant 0 : index
      %14 = arith.index_cast %10 : i32 to index
      %c0_5 = arith.constant 0 : index
      %15 = vector.load %arg6[%c0_4, %14, %c0_5] : memref<1x4x768xf32, #tpu.memory_space<vmem>>, vector<1x1x768xf32>
      %16 = vector.shape_cast %15 : vector<1x1x768xf32> to vector<1x768xf32>
      %17 = vector.broadcast %1 : f32 to vector<1x768xf32>
      %18 = arith.mulf %17, %16 : vector<1x768xf32>
      %19 = arith.addf %13, %18 : vector<1x768xf32>
      %c0_6 = arith.constant 0 : index
      %20 = arith.index_cast %arg8 : i32 to index
      %c0_7 = arith.constant 0 : index
      %21 = vector.load %arg7[%c0_6, %20, %c0_7] : memref<1x4x768xf32, #tpu.memory_space<vmem>>, vector<1x1x768xf32>
      %22 = vector.shape_cast %21 : vector<1x1x768xf32> to vector<1x768xf32>
      %23 = vector.shape_cast %19 : vector<1x768xf32> to vector<1x1x768xf32>
      tpu.vector_store %arg7[%c0_6, %20, %c0_7], %23 {strides = array<i32>} : memref<1x4x768xf32, #tpu.memory_space<vmem>>, vector<1x1x768xf32>,
    }
    %c4_i32_1 = arith.constant 4 : i32
    return
  }
  func.func @transform_0(%arg0: i32, %arg1: i32) -> (i32, i32) {
    %c0_i32 = arith.constant 0 : i32
    %c0_i32_0 = arith.constant 0 : i32
    %c0_i32_1 = arith.constant 0 : i32
    return %c0_i32, %c0_i32_0 : i32, i32
  }
  func.func @transform_1(%arg0: i32, %arg1: i32) -> (i32, i32) {
    %c0_i32 = arith.constant 0 : i32
    %c0_i32_0 = arith.constant 0 : i32
    %c0_i32_1 = arith.constant 0 : i32
    return %c0_i32, %c0_i32_0 : i32, i32
  }
  func.func @transform_2(%arg0: i32, %arg1: i32) -> i32 {
    %c0_i32 = arith.constant 0 : i32
    %c0_i32_0 = arith.constant 0 : i32
    return %c0_i32 : i32
  }
  func.func @transform_3(%arg0: i32, %arg1: i32) -> (i32, i32, i32) {
    %c0_i32 = arith.constant 0 : i32
    %c0_i32_0 = arith.constant 0 : i32
    %c0_i32_1 = arith.constant 0 : i32
    return %arg0, %c0_i32, %c0_i32_0 : i32, i32, i32
  }
  func.func @transform_4(%arg0: i32, %arg1: i32) -> (i32, i32, i32) {
    %c0_i32 = arith.constant 0 : i32
    %c0_i32_0 = arith.constant 0 : i32
    %c0_i32_1 = arith.constant 0 : i32
    return %arg0, %c0_i32, %c0_i32_0 : i32, i32, i32
  }
  func.func @transform_5(%arg0: i32, %arg1: i32) -> (i32, i32, i32) {
    %c0_i32 = arith.constant 0 : i32
    %c0_i32_0 = arith.constant 0 : i32
    return %arg0, %arg1, %c0_i32 : i32, i32, i32
  }
}

</mosaic_0001>

<bundles_post_ra>
// kernel: attention_pallas.3
= control target key start
LH: loop header
LB: loop body
LE: loop exit
PB: predicated region body
PF: predicated region fallthrough
CT: control target
= control target key end

     0   :  { %s753_s0 = inlined_call_operand.vmem [shape: s32[2,4], index: 0, kind: input, shape index: {}]   ;;  %s754_s1 = inlined_call_operand.vmem [shape: s32[2,4], index: 1, kind: input, shape index: {}]   ;;  %s755_s2 = inlined_call_operand.<no memory space> [shape: f32[1], index: 2, kind: input, shape index: {}]   ;;  %s756_s3 = inlined_call_operand.vmem [shape: f32[2,4,768], index: 3, kind: input, shape index: {}]   ;;  %s757_s4 = inlined_call_operand.vmem [shape: f32[2,4,768], index: 4, kind: input, shape index: {}]   ;;  %s758_s5 = inlined_call_operand.vmem [shape: f32[2,4,768], index: 5, kind: output, shape index: {}]  }
   0x1   :  { %759 = sst [smem:[#allocation9_spill]] %s753_s0 }
   0x2   :  { %10 = sst [smem:[#allocation2]] %s755_s2 }
   0x3   :  { %11 = vsyncpa [#allocation4], 0 }
   0x4   :  { %12 = vsyncpa [#allocation6], 0  ;;  %s656_s20 = smov 0   ;;  %s658_s21 = smov 0  }
   0x5   :  { %s660_s22 = smov 0  }
   0x6 LB: > { %s479_s2 = sadd.s32 4294967295, %s615_s22   ;;  %s30_s23 = sadd.s32 1, %s611_s21  ;;  %s615_s22 = sphi %s660_s22, %s18_s22   ;;  %s611_s21 = sphi %s658_s21, %s766_s21   ;;  %s607_s20 = sphi %s656_s20, %s765_s20  }
   0x7   : > { %p32_p0 = scmp.ge.s32.totalorder %s30_s23, 2  ;;  %p481_p1 = scmp.ge.s32.totalorder %s615_s22, 1 }
   0x8   : > { %p178_p2 = scmp.lt.s32.totalorder %s615_s22, 3  ;;  %p677_p4 = scmp.eq.s32.totalorder %s479_s2, 0 }
   0x9   : > { %s768_s23 = smov (%p32_p0, %s30_s23), 0  ;;  %s761_s0 = sld [smem:[#allocation9_spill]] }
   0xa   : > { %p179_p3 = pnand %p481_p1, %p178_p2  ;;  %s200_s30 = sshll.u32 %s754_s1, 4  ;;  %s201_s30 = int_to_ptr.vmem [resolvable:$true] %s200_s30 }
   0xb   : > { %s621_s6 = smov [#allocation3]   ;;  %s622_s7 = smov [#allocation5]  }
   0xc   : > { %p506_p5 = pneg %p179_p3 }
   0xd   : > { %232 = sbr.rel (%p179_p3) target bundleno = 50 (0x32), region = 40 }
   0xe   : > { %p507_p6 = pnand %p677_p4, %p506_p5 }
   0xf   : > { %s190_s27 = sshll.u32 %s761_s0, 4  ;;  %s191_s27 = int_to_ptr.vmem [resolvable:$true] %s190_s27 }
  0x10   : > { %509 = dma.vmem_to_smem (!%p507_p6), %s191_s27, 32, %s621_s6, [#allocation4]  }
  0x11   : > { %512 = dma.vmem_to_smem (!%p507_p6), %s201_s30, 32, %s622_s7, [#allocation6]  }
  0x12   : > { %598 = dma.done.wait (%p677_p4), [#allocation4], 32  }
  0x13   : > { %600 = vsyncadd (%p677_p4), [#allocation4], 4294967264 }
  0x14   : > { %602 = dma.done.wait (%p677_p4), [#allocation6], 32  }
  0x15   : > { %604 = vsyncadd (%p677_p4), [#allocation6], 4294967264 }
  0x16   : > { %244 = sfence }
  0x17   : > { %p276_p7 = scmp.lt.s32.totalorder %s607_s20, 1  ;;  %s698_s8 = sld [smem:[#allocation2]] }
  0x18   : > { %s715_s2 = smov 0  }
  0x19   : > { %s277_s9 = scalar_select %p276_p7, %s607_s20, 1 }
  0x1b   : > { %s701_s10 = smul.u32 24, %s277_s9 }
  0x1c LB: >> { %s304_s24 = sshra.s32 %s619_s2, 7  ;;  %s309_s25 = sand.u32 127, %s619_s2  ;;  %v334_v1 = vlaneseq  ;;  %s619_s2 = sphi %s715_s2, %s302_s2  }
  0x1d   : >> { %s306_s26 = sadd.s32 %s607_s20, %s304_s24  ;;  %s338_s6 = sshra.s32 %s619_s2, 2  ;;  %v331_v0 = vstv %s698_s8 }
  0x1e   : >> { %s491_s27 = sshll.u32 %s306_s26, 7  ;;  %s341_s7 = sand.u32 3, %s619_s2  ;;  %vm336_vm0 = vcmp.lt.s32.totalorder %v334_v1, 768 }
  0x1f   : >> { %s310_s28 = sadd.s32 %s491_s27, %s309_s25  ;;  %s494_s9 = smul.u32 24, %s338_s6 }
  0x20   : >> { %s311_s29 = sld [smem:[#allocation3 + %s310_s28]]  ;;  %s762_s24 = scalar_lea.vmem %s756_s3, %s701_s10 }
  0x21   : >> { %s312_s30 = sld [smem:[#allocation5 + %s310_s28]]  ;;  %s763_s6 = scalar_lea.vmem %s757_s4, %s701_s10 }
  0x22   : >> { %s302_s2 = sadd.s32 1, %s619_s2  }
  0x23   : >> { %p299_p8 = scmp.ge.s32.totalorder %s302_s2, 4  }
  0x26   : >> { %s313_s11 = sshra.s32 %s311_s29, 2  ;;  %s316_s12 = sand.u32 3, %s311_s29 }
  0x27   : >> { %s492_s14 = smul.u32 24, %s313_s11  ;;  %s322_s15 = sshra.s32 %s312_s30, 2 }
  0x28   : >> { %s325_s17 = sand.u32 3, %s312_s30  ;;  %s493_s18 = smul.u32 24, %s322_s15 }
  0x29   : >> { %s319_s19 = sadd.s32 %s492_s14, %s316_s12  ;;  %s344_s29 = sadd.s32 %s494_s9, %s341_s7 }
  0x2a   : >> { %s320_s26 = scalar_lea.vmem %s762_s24, %s319_s19  ;;  %s328_s25 = sadd.s32 %s493_s18, %s325_s17 }
  0x2b   : >> { %s329_s0 = scalar_lea.vmem %s763_s6, %s328_s25  ;;  %v321_v2 = vld [vmem:[%s320_s26] ss:$4 sm:$0x3f]  ;;  %s764_s12 = scalar_lea.vmem %s758_s5, %s701_s10 }
  0x2c   : >> { %v330_v3 = vld [vmem:[%s329_s0] ss:$4 sm:$0x3f]  ;;  %s345_s13 = scalar_lea.vmem %s764_s12, %s344_s29 }
  0x2d   : >> { %v332_v4 = vmul.f32 %v331_v0, %v330_v3  ;;  %301 = sbr.rel (!%p299_p8) target bundleno = 28 (0x1c), region = 92 }
  0x2f   : >> { %v333_v5 = vadd.f32 %v332_v4, %v321_v2 }
  0x31   : >> { %346 = vst.msk [vmem:[%s345_s13] ss:$4 sm:$0x3f] %vm336_vm0, %v333_v5 }
  0x32 PF: > { %s18_s22 = sadd.s32 1, %s615_s22   ;;  %s765_s20 = smov %s611_s21 }
  0x33   : > { %p15_p9 = scmp.ge.s32.totalorder %s18_s22, 4   ;;  %s766_s21 = smov %s768_s23 }
  0x35   :  { %17 = sbr.rel (!%p15_p9) target bundleno = 6 (0x6), region = 103 }
  0x3a   :  { %376 = vsyncpa [#allocation4], 1 }
  0x3b   :  { %378 = vsyncpa [#allocation4 + $0x1], 1 }
  0x3c   :  { %379 = vsyncpa [#allocation6], 1 }

// kernel: attention_pallas.2
= control target key start
LH: loop header
LB: loop body
LE: loop exit
PB: predicated region body
PF: predicated region fallthrough
CT: control target
= control target key end

     0   :  { %s980_s0 = inlined_call_operand.vmem [shape: f32[3], index: 0, kind: input, shape index: {}]   ;;  %s981_s1 = inlined_call_operand.<no memory space> [shape: f32[1], index: 1, kind: input, shape index: {}]   ;;  %s982_s2 = inlined_call_operand.vmem [shape: f32[3], index: 2, kind: input, shape index: {}]   ;;  %s983_s3 = inlined_call_operand.<no memory space> [shape: f32[1], index: 3, kind: input, shape index: {}]   ;;  %s984_s4 = inlined_call_operand.vmem [shape: f32[2,3,4,256], index: 4, kind: input, shape index: {}]   ;;  %s985_s5 = inlined_call_operand.vmem [shape: f32[2,3,4,256], index: 5, kind: input, shape index: {}]   ;;  %s986_s6 = inlined_call_operand.vmem [shape: s32[2,4,1], index: 6, kind: output, shape index: {0}]   ;;  %s987_s7 = inlined_call_operand.vmem [shape: s32[2,4,1], index: 7, kind: output, shape index: {1}]  }
   0x1   :  { %13 = sst [smem:[#allocation2]] %s981_s1 }
   0x2   :  { %14 = sst [smem:[#allocation3]] %s983_s3 }
   0x3   :  { %15 = vsyncpa [#allocation5], 0 }
   0x4   :  { %16 = vsyncpa [#allocation7], 0  ;;  %s908_s28 = smov 0   ;;  %s910_s29 = smov 0  }
   0x5   :  { %s912_s30 = smov 0  }
   0x6 LB: > { %s723_s1 = sadd.s32 4294967295, %s857_s30   ;;  %s34_s3 = sadd.s32 1, %s853_s29  ;;  %s857_s30 = sphi %s912_s30, %s22_s30   ;;  %s853_s29 = sphi %s910_s29, %s990_s29   ;;  %s849_s28 = sphi %s908_s28, %s989_s28  }
   0x7   : > { %p36_p0 = scmp.ge.s32.totalorder %s34_s3, 2  ;;  %p725_p1 = scmp.ge.s32.totalorder %s857_s30, 1 }
   0x8   : > { %p233_p2 = scmp.lt.s32.totalorder %s857_s30, 3  ;;  %p929_p4 = scmp.eq.s32.totalorder %s723_s1, 0 }
   0x9   : > { %s992_s3 = smov (%p36_p0, %s34_s3), 0  ;;  %s245_s11 = sshll.u32 %s980_s0, 4  ;;  %s246_s11 = int_to_ptr.vmem [resolvable:$true] %s245_s11 }
   0xa   : > { %p234_p3 = pnand %p725_p1, %p233_p2  ;;  %s258_s14 = sshll.u32 %s982_s2, 4  ;;  %s259_s14 = int_to_ptr.vmem [resolvable:$true] %s258_s14 }
   0xb   : > { %s859_s15 = smov [#allocation4]   ;;  %s860_s16 = smov [#allocation6]  }
   0xc   : > { %p755_p5 = pneg %p234_p3 }
   0xd   : > { %294 = sbr.rel (%p234_p3) target bundleno = 717 (0x2cd), region = 44 }
   0xe   : > { %p756_p6 = pnand %p929_p4, %p755_p5 }
  0x10   : > { %758 = dma.vmem_to_smem (!%p756_p6), %s246_s11, 16, %s859_s15, [#allocation5]  }
  0x11   : > { %761 = dma.vmem_to_smem (!%p756_p6), %s259_s14, 16, %s860_s16, [#allocation7]  }
  0x12   : > { %840 = dma.done.wait (%p929_p4), [#allocation5], 16  }
  0x13   : > { %842 = vsyncadd (%p929_p4), [#allocation5], 4294967280 }
  0x14   : > { %844 = dma.done.wait (%p929_p4), [#allocation7], 16  }
  0x15   : > { %846 = vsyncadd (%p929_p4), [#allocation7], 4294967280 }
  0x16   : > { %306 = sfence }
  0x17   : > { %p351_p7 = scmp.lt.s32.totalorder %s849_s28, 1  ;;  %s380_s17 = sld [smem:[#allocation4]]  ;;  %vm425_vm0 = vcmask 1043456   ;;  %v861_v45 = vmov 839922192   ;;  %vm523_vm7 = vcmask 27648  }
  0x18   : > { %s384_s18 = sld [smem:[#allocation6]]  ;;  %v444_v46 = vunpack.c.l.s4 %v861_v45  ;;  %vm564_vm12 = vcmask 3072  }
  0x19   : > { %s994_s28 = smov (!%p351_p7, %s849_s28), 1  ;;  %s736_s19 = sld [smem:[#allocation4 + $0x1]] }
  0x1a   : > { %s746_s20 = smul.u32 24, %s994_s28  ;;  %s738_s21 = sld [smem:[#allocation6 + $0x1]]  ;;  %v445_v50 = vunpack.c.0.s8 %v444_v46 }
  0x1b   : > { %s740_s22 = sld [smem:[#allocation4 + $0x2]]  ;;  %s734_s11 = sshll.u32 %s994_s28, 2 }
  0x1c   : > { %s359_s25 = scalar_lea.vmem %s984_s4, %s746_s20  ;;  %s364_s1 = scalar_lea.vmem %s985_s5, %s746_s20 }
  0x1d   : > { %v382_v0 = vstv %s380_s17  ;;  %v381_v1 = vld [vmem:[%s359_s25] sm:$0xff]  ;;  %v737_v4 = vld [vmem:[%s359_s25 + $0x8] sm:$0xff]  ;;  %s742_s8 = sld [smem:[#allocation6 + $0x2]]  ;;  %v741_v9 = vld [vmem:[%s359_s25 + $0x10] sm:$0xff]  ;;  %s371_s14 = scalar_lea.vmem %s986_s6, %s734_s11 }
  0x1e   : > { %v385_v2 = vld [vmem:[%s364_s1] sm:$0xff]  ;;  %v386_v3 = vstv %s384_s18  ;;  %v383_v5 = vmul.f32 %v382_v0, %v381_v1  ;;  %v739_v6 = vld [vmem:[%s364_s1 + $0x8] sm:$0xff]  ;;  %s412_s9 = sld [smem:[#allocation2]]  ;;  %v743_v14 = vld [vmem:[%s364_s1 + $0x10] sm:$0xff]  ;;  %s378_s17 = scalar_lea.vmem %s987_s7, %s734_s11 }
  0x1f   : > { %v387_v7 = vmul.f32 %v386_v3, %v385_v2  ;;  %v391_v8 = vstv %s736_s19  ;;  %s415_s10 = sld [smem:[#allocation3]] }
  0x20   : > { %v392_v10 = vmul.f32 %v737_v4, %v391_v8  ;;  %v397_v11 = vstv %s738_s21 }
  0x21   : > { %v398_v12 = vmul.f32 %v739_v6, %v397_v11  ;;  %v403_v13 = vstv %s740_s22 }
  0x22   : > { %v393_v15 = vadd.f32 %v392_v10, %v383_v5  ;;  %v404_v16 = vmul.f32 %v741_v9, %v403_v13 }
  0x23   : > { %v399_v17 = vadd.f32 %v398_v12, %v387_v7  ;;  %v409_v18 = vstv %s742_s8 }
  0x24   : > { %v405_v19 = vadd.f32 %v404_v16, %v393_v15  ;;  %v410_v20 = vmul.f32 %v743_v14, %v409_v18  ;;  %v413_v21 = vstv %s412_s9  ;;  %v521_v14 = vlaneseq }
  0x25   : > { %v416_v24 = vstv %s415_s10 }
  0x26   : > { %v411_v22 = vadd.f32 %v410_v20, %v399_v17  ;;  %v414_v23 = vadd.f32 %v413_v21, %v405_v19  ;;  %v522_v15 = vand.u32 127, %v521_v14 }
  0x28   : > { %v418_v25 = vmul.f32 %v414_v23, %v414_v23  ;;  %v417_v26 = vadd.f32 %v416_v24, %v411_v22 }
  0x2a   : > { %420 = vst [vmem:[#allocation1] ss:$2 sm:$0xff] %v418_v25  ;;  %v449_v27 = vmul.f32 %v417_v26, %v417_v26 }
  0x31   : > { %v421_v28 = vld.sshfl [vmem:[#allocation1] sm:$0xff pattern:$0x75316420]  ;;  %v422_v29 = vld.sshfl [vmem:[#allocation1 + $0x8] sm:$0xff pattern:$0x75316420] }
  0x32   : > { %v426_v30 = vsel %vm425_vm0, %v421_v28, 0.0  ;;  %v427_v31 = vsel %vm425_vm0, %v422_v29, 0.0  ;;  %451 = vst [vmem:[#allocation1] ss:$2 sm:$0xff] %v449_v27 }
  0x33   : > { %v428_v32 = vadd.f32 %v427_v31, %v426_v30 }
  0x35   : > { %429 = vadd.xlane.f32.xlu0 %v428_v32 }
  0x39   : > { %v452_v33 = vld.sshfl [vmem:[#allocation1] sm:$0xff pattern:$0x75316420]  ;;  %v453_v34 = vld.sshfl [vmem:[#allocation1 + $0x8] sm:$0xff pattern:$0x75316420] }
  0x3a   : > { %v456_v35 = vsel %vm425_vm0, %v452_v33, 0.0  ;;  %v457_v36 = vsel %vm425_vm0, %v453_v34, 0.0 }
  0x3b   : > { %v458_v37 = vadd.f32 %v457_v36, %v456_v35 }
  0x3d   : > { %459 = vadd.xlane.f32.xlu0 %v458_v37 }
  0xa8   : > { %v430_v38 = vpop.xlane.xlu0 %429 }
  0xa9   : > { %v431_v39 = vmax.f32 %v430_v38, 1e-24 }
  0xab   : > { %793 = vrsqrt.f32 %v431_v39  ;;  %vm438_vm2 = vweird.f32 %v431_v39 }
  0xb0   : > { %v460_v40 = vpop.xlane.xlu0 %459 }
  0xb1   : > { %v794_v41 = vpop.eup %793  ;;  %v461_v42 = vmax.f32 %v460_v40, 1e-24 }
  0xb2   : > { %v433_v43 = vmul.f32 %v794_v41, %v431_v39  ;;  %vm439_vm1 = vweird.f32 %v794_v41 }
  0xb3   : > { %795 = vrsqrt.f32 %v461_v42  ;;  %vm440_vm3 = vmor %vm438_vm2, %vm439_vm1  ;;  %vm468_vm5 = vweird.f32 %v461_v42 }
  0xb4   : > { %v434_v44 = vmul.f32 %v794_v41, %v433_v43 }
  0xb6   : > { %v435_v47 = vmul.f32 0.5, %v434_v44 }
  0xb8   : > { %v436_v48 = vsub.f32 1.5, %v435_v47 }
  0xb9   : > { %v796_v49 = vpop.eup %795 }
  0xba   : > { %v437_v51 = vmul.f32 %v794_v41, %v436_v48  ;;  %v463_v52 = vmul.f32 %v796_v49, %v461_v42  ;;  %vm469_vm4 = vweird.f32 %v796_v49 }
  0xbb   : > { %vm470_vm6 = vmor %vm468_vm5, %vm469_vm4 }
  0xbc   : > { %v441_v53 = vsel %vm440_vm3, %v794_v41, %v437_v51  ;;  %v464_v54 = vmul.f32 %v796_v49, %v463_v52 }
  0xbd   : > { %v446_v55 = vperm.slane %v441_v53, %v445_v50 }
  0xbe   : > { %v465_v56 = vmul.f32 0.5, %v464_v54 }
  0xbf   : > { %v448_v57 = vmul.f32 %v446_v55, %v414_v23 }
  0xc0   : > { %v466_v58 = vsub.f32 1.5, %v465_v56 }
  0xc1   : > { %480 = vst [vmem:[#allocation1] ss:$2 sm:$0xff] %v448_v57 }
  0xc2   : > { %v467_v59 = vmul.f32 %v796_v49, %v466_v58 }
  0xc4   : > { %v471_v60 = vsel %vm470_vm6, %v796_v49, %v467_v59 }
  0xc5   : > { %v476_v61 = vperm.slane %v471_v60, %v445_v50 }
  0xc7   : > { %v478_v62 = vmul.f32 %v476_v61, %v417_v26 }
  0xc8   : > { %v481_v63 = vld.sshfl [vmem:[#allocation1] sm:$0xff pattern:$0x75316420]  ;;  %v482_v0 = vld.sshfl [vmem:[#allocation1 + $0x8] sm:$0xff pattern:$0x75316420] }
  0xc9   : > { %488 = vst [vmem:[#allocation1] ss:$2 sm:$0xff] %v478_v62  ;;  %v485_v5 = vpack.c.bf16 %v481_v63, %v481_v63  ;;  %v486_v6 = vpack.c.bf16 %v482_v0, %v482_v0 }
  0xd0   : > { %v489_v1 = vld.sshfl [vmem:[#allocation1] sm:$0xff pattern:$0x75316420]  ;;  %v490_v2 = vld.sshfl [vmem:[#allocation1 + $0x8] sm:$0xff pattern:$0x75316420] }
  0xd1   : > { %v493_v3 = vpack.c.bf16 %v489_v1, %v489_v1  ;;  %v494_v4 = vpack.c.bf16 %v490_v2, %v490_v2 }
  0xd3   : > { %502 = vmatpush.bf16.xpose.msra.mxu0 %v493_v3  ;;  %515 = vmatpush.bf16.xpose.msra.mxu1 %v494_v4 }
  0xda   : > { %503 = vmatmul.bf16.vlgmr.msra.gmra.mxu0 %v485_v5  ;;  %516 = vmatmul.bf16.vlgmr.msra.gmra.mxu1 %v486_v6 }
 0x157   : > { %v504_v7 = vpop.f32.mrf.mxu0  ;;  %v517_v8 = vpop.f32.mrf.mxu1 }
 0x158   : > { %v518_v9 = vadd.f32 %v517_v8, %v504_v7 }
 0x15a   : > { %v524_v10 = vsel %vm523_vm7, %v518_v9, -inf  ;;  %v544_v13 = vsel %vm523_vm7, %v518_v9, inf }
 0x15b   : > { %525 = vmax.xlane.f32.xlu1 %v524_v10 }
 0x15f   : > { %v506_v11 = vpop.f32.mrf.mxu0  ;;  %v519_v12 = vpop.f32.mrf.mxu1 }
 0x163   : > { %545 = vmin.xlane.f32.xlu1 %v544_v13 }
 0x1ce   : > { %v526_v16 = vpop.xlane.xlu1 %525 }
 0x1cf   : > { %vm527_vm8 = vcmp.eq.f32.partialorder %v518_v9, %v526_v16 }
 0x1d0   : > { %v528_v17 = vsel %vm527_vm8, %v522_v15, 4 }
 0x1d1   : > { %v529_v18 = vsel %vm523_vm7, %v528_v17, 2147483647 }
 0x1d2   : > { %v531_v19 = vshra.s32 %v529_v18, 16  ;;  %v530_v26 = vand.u32 65535, %v529_v18 }
 0x1d4   : > { %v533_v20 = vcvt.s32.f32 %v531_v19  ;;  %v532_v28 = vcvt.s32.f32 %v530_v26 }
 0x1d6   : > { %534 = vmin.xlane.f32.xlu2 %v533_v20  ;;  %v546_v21 = vpop.xlane.xlu1 %545 }
 0x1d7   : > { %vm547_vm9 = vcmp.eq.f32.partialorder %v518_v9, %v546_v21 }
 0x1d8   : > { %v548_v22 = vsel %vm547_vm9, %v522_v15, 4 }
 0x1d9   : > { %v549_v23 = vsel %vm523_vm7, %v548_v22, 2147483647 }
 0x1da   : > { %v551_v24 = vshra.s32 %v549_v23, 16  ;;  %v550_v30 = vand.u32 65535, %v549_v23 }
 0x1dc   : > { %v553_v25 = vcvt.s32.f32 %v551_v24  ;;  %v552_v32 = vcvt.s32.f32 %v550_v30 }
 0x1de   : > { %554 = vmin.xlane.f32.xlu2 %v553_v25 }
 0x249   : > { %v535_v27 = vpop.xlane.xlu2 %534 }
 0x24a   : > { %vm536_vm10 = vcmp.eq.f32.partialorder %v533_v20, %v535_v27  ;;  %v541_v34 = vcvt.f32.s32 %v535_v27 }
 0x24b   : > { %v537_v29 = vsel %vm536_vm10, %v532_v28, inf }
 0x24c   : > { %538 = vmin.xlane.f32.xlu0 %v537_v29  ;;  %v542_v36 = vshll.u32 %v541_v34, 16 }
 0x251   : > { %v555_v31 = vpop.xlane.xlu2 %554 }
 0x252   : > { %vm556_vm11 = vcmp.eq.f32.partialorder %v553_v25, %v555_v31  ;;  %v561_v39 = vcvt.f32.s32 %v555_v31 }
 0x253   : > { %v557_v33 = vsel %vm556_vm11, %v552_v32, inf }
 0x254   : > { %558 = vmin.xlane.f32.xlu1 %v557_v33  ;;  %v562_v41 = vshll.u32 %v561_v39, 16 }
 0x2bf   : > { %v539_v35 = vpop.xlane.xlu0 %538 }
 0x2c0   : > { %v540_v37 = vcvt.f32.s32 %v539_v35 }
 0x2c2   : > { %v543_v38 = vadd.s32 %v542_v36, %v540_v37 }
 0x2c4   : > { %565 = vst.msk [vmem:[%s371_s14] sm:$0xf] %vm564_vm12, %v543_v38 }
 0x2c7   : > { %v559_v40 = vpop.xlane.xlu1 %558 }
 0x2c8   : > { %v560_v42 = vcvt.f32.s32 %v559_v40 }
 0x2ca   : > { %v563_v43 = vadd.s32 %v562_v41, %v560_v42 }
 0x2cc   : > { %566 = vst.msk [vmem:[%s378_s17] sm:$0xf] %vm564_vm12, %v563_v43 }
 0x2cd PF: > { %s22_s30 = sadd.s32 1, %s857_s30   ;;  %s989_s28 = smov %s853_s29 }
 0x2ce   : > { %p19_p8 = scmp.ge.s32.totalorder %s22_s30, 4   ;;  %s990_s29 = smov %s992_s3 }
 0x2d0   :  { %21 = sbr.rel (!%p19_p8) target bundleno = 6 (0x6), region = 102 }
 0x2d5   :  { %612 = vsyncpa [#allocation5], 1 }
 0x2d6   :  { %614 = vsyncpa [#allocation5 + $0x1], 1 }
 0x2d7   :  { %615 = vsyncpa [#allocation7], 1 }

</bundles_post_ra>
